<compile_context>
chip_gen: v6e
topology: v6e:2x2x1
jax: 0.10.0
libtpu: 0.0.40
codegen_flags: <defaults>
</compile_context>

<pallas_src>
import jax
import jax.numpy as jnp
from jax.experimental import pallas as pl
from jax.experimental.pallas import tpu as pltpu

HIDDEN = 512  # fixed by the module definition


def _round_up(x, m):
    return (x + m - 1) // m * m


def mlp_kernel(x_ref, w1_ref, b1_ref, w2_ref, b2_ref, o_ref):
    # Layer 1: Linear + ReLU. MXU matmul in the weights' dtype, f32 accumulation.
    x = x_ref[...]
    h = jnp.dot(x.astype(w1_ref.dtype), w1_ref[...],
                preferred_element_type=jnp.float32)
    h = jnp.maximum(h + b1_ref[...].astype(jnp.float32), 0.0)   # bias + ReLU on VPU (f32)
    # Layer 2: Linear. Bias is fused into the final (lane-dense) store.
    out = jnp.dot(h.astype(w2_ref.dtype), w2_ref[...],
                  preferred_element_type=jnp.float32)
    o_ref[...] = (out + b2_ref[...].astype(jnp.float32)).astype(o_ref.dtype)


def pad_mlp_params(w1, b1, w2, b2):
    """One-time (init-time) parameter prep: lane-pad the output layer to 128.

    Zero padding is exact for this math. Returns (w1, b1, w2_padded, b2_padded).
    Call this ONCE and reuse the result for every forward call.
    """
    n_in, hidden = w1.shape
    n_targets = w2.shape[1]
    assert hidden == HIDDEN and w2.shape[0] == HIDDEN
    n_pad = _round_up(n_targets, 128)
    w2p = jnp.zeros((hidden, n_pad), w2.dtype).at[:, :n_targets].set(w2)
    b2p = jnp.zeros((1, n_pad), b2.dtype).at[:, :n_targets].set(b2.reshape(1, n_targets))
    return w1, b1.reshape(1, hidden), w2p, b2p


def mlp_forward(x, w1, b1, w2p, b2p, *, n_targets=None, tm=1024, out_dtype=None):
    """relu(x @ w1 + b1) @ w2 + b2.

    x:    (batch, n_inputs), unpadded.
    w1:   (n_inputs, HIDDEN), b1: (1, HIDDEN).
    w2p:  (HIDDEN, n_pad), b2p: (1, n_pad)  -- from pad_mlp_params (n_pad % 128 == 0).
    n_targets=None returns the lane-padded (batch, n_pad) output (no extra slice pass).
    out_dtype defaults to x.dtype (use bf16 I/O to halve HBM traffic).
    """
    batch, n_in = x.shape
    hidden = w1.shape[1]
    n_pad = w2p.shape[1]
    assert w1.shape == (n_in, hidden) and w2p.shape[0] == hidden
    assert n_pad % 128 == 0
    if out_dtype is None:
        out_dtype = x.dtype

    # Batch tile: multiple of 8 sublanes; ragged last grid block is fine (its
    # out-of-bounds rows are never written back).
    tm_eff = min(tm, _round_up(batch, 8))
    grid = (pl.cdiv(batch, tm_eff),)

    flops = 2 * batch * (n_in * hidden + hidden * n_pad)
    bytes_accessed = (
        batch * n_in * x.dtype.itemsize
        + batch * n_pad * jnp.dtype(out_dtype).itemsize
        + w1.size * w1.dtype.itemsize + b1.size * b1.dtype.itemsize
        + w2p.size * w2p.dtype.itemsize + b2p.size * b2p.dtype.itemsize
    )

    out_padded = pl.pallas_call(
        mlp_kernel,
        out_shape=jax.ShapeDtypeStruct((batch, n_pad), out_dtype),
        grid_spec=pltpu.PrefetchScalarGridSpec(
            num_scalar_prefetch=0,
            grid=grid,
            in_specs=[
                pl.BlockSpec((tm_eff, n_in),   lambda i: (i, 0)),  # x: tiled over batch, K unpadded
                pl.BlockSpec((n_in, hidden),   lambda i: (0, 0)),  # w1: VMEM-resident
                pl.BlockSpec((1, hidden),      lambda i: (0, 0)),  # b1: resident
                pl.BlockSpec((hidden, n_pad),  lambda i: (0, 0)),  # w2: resident
                pl.BlockSpec((1, n_pad),       lambda i: (0, 0)),  # b2: resident
            ],
            out_specs=pl.BlockSpec((tm_eff, n_pad), lambda i: (i, 0)),
        ),
        compiler_params=pltpu.CompilerParams(
            dimension_semantics=("parallel",),   # megacore: shard batch across TCs (v7x)
        ),
        cost_estimate=pl.CostEstimate(flops=flops, transcendentals=0,
                                      bytes_accessed=bytes_accessed),
    )(x, w1, b1, w2p, b2p)

    if n_targets is None or n_targets == n_pad:
        return out_padded          # lane-padded layout; consumer masks pad columns
    return out_padded[:, :n_targets]


def init_params(key, n_inputs, n_targets, dtype=jnp.float32):
    # Deterministic init mimicking torch.nn.Linear's default:
    # U(-1/sqrt(fan_in), 1/sqrt(fan_in)) for both weight and bias.
    k1, k2, k3, k4 = jax.random.split(key, 4)
    bound1 = 1.0 / (n_inputs ** 0.5)
    bound2 = 1.0 / (HIDDEN ** 0.5)
    w1 = jax.random.uniform(k1, (n_inputs, HIDDEN), jnp.float32, -bound1, bound1).astype(dtype)
    b1 = jax.random.uniform(k2, (1, HIDDEN), jnp.float32, -bound1, bound1).astype(dtype)
    w2 = jax.random.uniform(k3, (HIDDEN, n_targets), jnp.float32, -bound2, bound2).astype(dtype)
    b2 = jax.random.uniform(k4, (1, n_targets), jnp.float32, -bound2, bound2).astype(dtype)
    return w1, b1, w2, b2


if __name__ == "__main__":
    key = jax.random.PRNGKey(0)
    kx, kp = jax.random.split(key)

    # Small shapes consistent with the n-gram MLP: a batch of flattened
    # context embeddings -> vocab-size logits.
    batch, n_inputs, n_targets = 8, 64, 27

    x = jax.random.normal(kx, (batch, n_inputs), dtype=jnp.float32)
    w1, b1, w2, b2 = init_params(kp, n_inputs, n_targets)

    fwd = jax.jit(mlp_forward, static_argnames=("n_targets", "tm", "out_dtype"))

    # --- f32 path (strict check); params padded ONCE outside the forward -----
    params_f32 = pad_mlp_params(w1, b1, w2, b2)
    out = fwd(x, *params_f32, n_targets=n_targets)
    out = jax.block_until_ready(out)
    ref = jnp.maximum(x @ w1 + b1, 0.0) @ w2 + b2
    assert out.shape == (batch, n_targets)
    assert jnp.allclose(out, ref, atol=1e-5, rtol=1e-5)

    # --- bf16 streaming path (half the HBM bytes; full MXU rate on v6e/v7x) ---
    params_bf16 = pad_mlp_params(w1.astype(jnp.bfloat16), b1.astype(jnp.bfloat16),
                                 w2.astype(jnp.bfloat16), b2.astype(jnp.bfloat16))
    out_bf16 = fwd(x.astype(jnp.bfloat16), *params_bf16, n_targets=n_targets)
    out_bf16 = jax.block_until_ready(out_bf16)
    assert out_bf16.shape == (batch, n_targets)
    assert out_bf16.dtype == jnp.bfloat16
    assert jnp.allclose(out_bf16.astype(jnp.float32), ref, atol=5e-2, rtol=5e-2)

    # --- padded-output path (no post-kernel slice pass) -----------------------
    out_pad = fwd(x.astype(jnp.bfloat16), *params_bf16)      # n_targets=None
    out_pad = jax.block_until_ready(out_pad)
    assert out_pad.shape == (batch, _round_up(n_targets, 128))

    print("KERNEL_OK")
</pallas_src>

<mosaic_0001>
module attributes {stable_mosaic.version = 11 : i64} {
  func.func @mlp_kernel(%arg0: i32, %arg1: memref<8x64xf32, #tpu.memory_space<vmem>>, %arg2: memref<64x512xf32, #tpu.memory_space<vmem>>, %arg3: memref<1x512xf32, #tpu.memory_space<vmem>>, %arg4: memref<512x128xf32, #tpu.memory_space<vmem>>, %arg5: memref<1x128xf32, #tpu.memory_space<vmem>>, %arg6: memref<8x128xf32, #tpu.memory_space<vmem>>) attributes {dimension_semantics = [#tpu.dimension_semantics<parallel>], iteration_bounds = array<i64: 1>, scalar_prefetch = 0 : i64, scratch_operands = 0 : i64, tpu.core_type = #tpu.core_type<tc>, window_params = [{transform_indices = @transform_0, window_bounds = array<i64: 8, 64>}, {pipeline_mode = #tpu.pipeline_mode<synchronous>, transform_indices = @transform_1, window_bounds = array<i64: 64, 512>}, {pipeline_mode = #tpu.pipeline_mode<synchronous>, transform_indices = @transform_2, window_bounds = array<i64: 1, 512>}, {pipeline_mode = #tpu.pipeline_mode<synchronous>, transform_indices = @transform_3, window_bounds = array<i64: 512, 128>}, {pipeline_mode = #tpu.pipeline_mode<synchronous>, transform_indices = @transform_4, window_bounds = array<i64: 1, 128>}, {transform_indices = @transform_5, window_bounds = array<i64: 8, 128>}]} {
    %c0 = arith.constant 0 : index
    %c0_0 = arith.constant 0 : index
    %0 = vector.load %arg1[%c0, %c0_0] : memref<8x64xf32, #tpu.memory_space<vmem>>, vector<8x64xf32>
    %c0_1 = arith.constant 0 : index
    %c0_2 = arith.constant 0 : index
    %1 = vector.load %arg2[%c0_1, %c0_2] : memref<64x512xf32, #tpu.memory_space<vmem>>, vector<64x512xf32>
    %cst = arith.constant dense<0.000000e+00> : vector<8x512xf32>
    %2 = tpu.matmul %0, %1, %cst {dimension_numbers = #tpu.dot_dimension_numbers<[1], [0], [0], [1], [0, 0, 1, 1], [], []>} : vector<8x64xf32>, vector<64x512xf32>, vector<8x512xf32> -> vector<8x512xf32>
    %c0_3 = arith.constant 0 : index
    %c0_4 = arith.constant 0 : index
    %3 = vector.load %arg3[%c0_3, %c0_4] : memref<1x512xf32, #tpu.memory_space<vmem>>, vector<1x512xf32>
    %4 = vector.broadcast %3 : vector<1x512xf32> to vector<8x512xf32>
    %5 = arith.addf %2, %4 : vector<8x512xf32>
    %cst_5 = arith.constant 0.000000e+00 : f32
    %6 = vector.broadcast %cst_5 : f32 to vector<8x512xf32>
    %7 = arith.maximumf %5, %6 : vector<8x512xf32>
    %c0_6 = arith.constant 0 : index
    %c0_7 = arith.constant 0 : index
    %8 = vector.load %arg4[%c0_6, %c0_7] : memref<512x128xf32, #tpu.memory_space<vmem>>, vector<512x128xf32>
    %cst_8 = arith.constant dense<0.000000e+00> : vector<8x128xf32>
    %9 = tpu.matmul %7, %8, %cst_8 {dimension_numbers = #tpu.dot_dimension_numbers<[1], [0], [0], [1], [0, 0, 1, 1], [], []>} : vector<8x512xf32>, vector<512x128xf32>, vector<8x128xf32> -> vector<8x128xf32>
    %c0_9 = arith.constant 0 : index
    %c0_10 = arith.constant 0 : index
    %10 = vector.load %arg5[%c0_9, %c0_10] : memref<1x128xf32, #tpu.memory_space<vmem>>, vector<1x128xf32>
    %11 = vector.broadcast %10 : vector<1x128xf32> to vector<8x128xf32>
    %12 = arith.addf %9, %11 : vector<8x128xf32>
    %c0_11 = arith.constant 0 : index
    %c0_12 = arith.constant 0 : index
    %13 = vector.load %arg6[%c0_11, %c0_12] : memref<8x128xf32, #tpu.memory_space<vmem>>, vector<8x128xf32>
    tpu.vector_store %arg6[%c0_11, %c0_12], %12 {strides = array<i32>} : memref<8x128xf32, #tpu.memory_space<vmem>>, vector<8x128xf32>,
    return
  }
  func.func @transform_0(%arg0: i32) -> (i32, i32) {
    %c0_i32 = arith.constant 0 : i32
    %c0_i32_0 = arith.constant 0 : i32
    return %arg0, %c0_i32 : i32, i32
  }
  func.func @transform_1(%arg0: i32) -> (i32, i32) {
    %c0_i32 = arith.constant 0 : i32
    %c0_i32_0 = arith.constant 0 : i32
    %c0_i32_1 = arith.constant 0 : i32
    return %c0_i32, %c0_i32_0 : i32, i32
  }
  func.func @transform_2(%arg0: i32) -> (i32, i32) {
    %c0_i32 = arith.constant 0 : i32
    %c0_i32_0 = arith.constant 0 : i32
    %c0_i32_1 = arith.constant 0 : i32
    return %c0_i32, %c0_i32_0 : i32, i32
  }
  func.func @transform_3(%arg0: i32) -> (i32, i32) {
    %c0_i32 = arith.constant 0 : i32
    %c0_i32_0 = arith.constant 0 : i32
    %c0_i32_1 = arith.constant 0 : i32
    return %c0_i32, %c0_i32_0 : i32, i32
  }
  func.func @transform_4(%arg0: i32) -> (i32, i32) {
    %c0_i32 = arith.constant 0 : i32
    %c0_i32_0 = arith.constant 0 : i32
    %c0_i32_1 = arith.constant 0 : i32
    return %c0_i32, %c0_i32_0 : i32, i32
  }
  func.func @transform_5(%arg0: i32) -> (i32, i32) {
    %c0_i32 = arith.constant 0 : i32
    %c0_i32_0 = arith.constant 0 : i32
    return %arg0, %c0_i32 : i32, i32
  }
}

</mosaic_0001>

<bundles_post_ra>
// kernel: mlp_forward.1
= control target key start
LH: loop header
LB: loop body
LE: loop exit
PB: predicated region body
PF: predicated region fallthrough
CT: control target
= control target key end

     0   :  { %10 = vsyncpa [#allocation3], 0  ;;  %s755_s0 = inlined_call_operand.hbm [shape: f32[8,64], index: 0, kind: input, shape index: {}]   ;;  %s756_s1 = inlined_call_operand.hbm [shape: f32[64,512], index: 1, kind: input, shape index: {}]   ;;  %s757_s2 = inlined_call_operand.hbm [shape: f32[1,512], index: 2, kind: input, shape index: {}]   ;;  %s758_s3 = inlined_call_operand.hbm [shape: f32[512,128], index: 3, kind: input, shape index: {}]   ;;  %s759_s4 = inlined_call_operand.vmem [shape: f32[1,128], index: 4, kind: input, shape index: {}]   ;;  %s760_s5 = inlined_call_operand.hbm [shape: f32[8,128], index: 5, kind: output, shape index: {}]  }
   0x1   :  { %11 = vsyncpa [#allocation6], 0 }
   0x2   :  { %12 = vsyncpa [#allocation9], 0 }
   0x3   :  { %13 = vsyncpa [#allocation4], 0  ;;  %s697_s18 = smov [#allocation5]  }
   0x4   :  { %s29_s19 = sshll.u32 %s697_s18, 4  ;;  %s30_s19 = int_to_ptr.vmem [resolvable:$true] %s29_s19 }
   0x5   :  { %s597_s20 = scalar_lea.vmem %s30_s19, 4096  ;;  %p602_p1 = scmp.lt.s32.totalorder %s30_s19, %s30_s19 }
   0x6   :  { %p598_p0 = scmp.ne.s32.totalorder %s30_s19, %s597_s20  ;;  %p603_p2 = scmp.lt.s32.totalorder %s597_s20, %s597_s20 }
   0x8   :  { %p604_p3 = por %p603_p2, %p602_p1 }
   0xa   :  { %p605_p4 = pnand %p604_p3, %p598_p0 }
   0xc   :  { %608 = shalt.err (!%p605_p4)
}
   0xd   :  { %s698_s21 = smov 512   ;;  %s699_s22 = smov 32  }
   0xe   :  { %35 = dma.hbm_to_vmem [thread:$0]  %s756_s1, 4096, %s30_s19, [#allocation6], %s698_s21, %s698_s21, %s699_s22  }
   0xf   :  { %s700_s25 = smov [#allocation2]   ;;  %s701_s27 = smov [#allocation7]  }
  0x10   :  { %s20_s26 = sshll.u32 %s700_s25, 4  ;;  %s42_s28 = sshll.u32 %s701_s27, 4  ;;  %s21_s26 = int_to_ptr.vmem [resolvable:$true] %s20_s26  ;;  %s43_s28 = int_to_ptr.vmem [resolvable:$true] %s42_s28 }
  0x11   :  { %s617_s29 = scalar_lea.vmem %s21_s26, 128  ;;  %p622_p6 = scmp.lt.s32.totalorder %s21_s26, %s21_s26 }
  0x12   :  { %p618_p5 = scmp.ne.s32.totalorder %s21_s26, %s617_s29  ;;  %p623_p7 = scmp.lt.s32.totalorder %s617_s29, %s617_s29 }
  0x14   :  { %p624_p8 = por %p623_p7, %p622_p6 }
  0x16   :  { %p625_p9 = pnand %p624_p8, %p618_p5 }
  0x18   :  { %628 = shalt.err (!%p625_p9)
}
  0x19   :  { %23 = dma.hbm_to_vmem [thread:$0]  %s755_s0, 128, %s21_s26, [#allocation3]  }
  0x1a   :  { %s637_s7 = scalar_lea.vmem %s43_s28, 64  ;;  %p642_p11 = scmp.lt.s32.totalorder %s43_s28, %s43_s28 }
  0x1b   :  { %p638_p10 = scmp.ne.s32.totalorder %s43_s28, %s637_s7  ;;  %p643_p12 = scmp.lt.s32.totalorder %s637_s7, %s637_s7 }
  0x1d   :  { %p644_p13 = por %p643_p12, %p642_p11 }
  0x1f   :  { %p645_p0 = pnand %p644_p13, %p638_p10 }
  0x21   :  { %648 = shalt.err (!%p645_p0)
}
  0x22   :  { %45 = dma.hbm_to_vmem [thread:$0]  %s757_s2, 64, %s43_s28, [#allocation6]  }
  0x23   :  { %s702_s9 = smov [#allocation8]  }
  0x24   :  { %s51_s10 = sshll.u32 %s702_s9, 4  ;;  %s52_s10 = int_to_ptr.vmem [resolvable:$true] %s51_s10 }
  0x25   :  { %s657_s11 = scalar_lea.vmem %s52_s10, 8192  ;;  %p662_p2 = scmp.lt.s32.totalorder %s52_s10, %s52_s10 }
  0x26   :  { %p658_p1 = scmp.ne.s32.totalorder %s52_s10, %s657_s11  ;;  %p663_p3 = scmp.lt.s32.totalorder %s657_s11, %s657_s11 }
  0x28   :  { %p664_p4 = por %p663_p3, %p662_p2 }
  0x2a   :  { %p665_p5 = pnand %p664_p4, %p658_p1 }
  0x2c   :  { %668 = shalt.err (!%p665_p5)
}
  0x2d   :  { %s703_s0 = smov 128   ;;  %s704_s12 = smov 8  }
  0x2e   :  { %57 = dma.hbm_to_vmem [thread:$0]  %s758_s3, 8192, %s52_s10, [#allocation9], %s703_s0, %s703_s0, %s704_s12  }
  0x2f   :  { %689 = dma.done.wait [#allocation3], 128  }
  0x30   :  { %690 = vsyncadd [#allocation3], 4294967168 }
  0x31   :  { %691 = dma.done.wait [#allocation6], 4160  }
  0x32   :  { %692 = vsyncadd [#allocation6], 4294963136 }
  0x33   :  { %693 = dma.done.wait [#allocation9], 8192  }
  0x34   :  { %694 = vsyncadd [#allocation9], 4294959104  ;;  %v705_v0 = vmov 0.0   ;;  %v102_v1 = vld [vmem:[#allocation5 + $0xe8] sm:$0xff]  ;;  %v104_v2 = vld [vmem:[#allocation5 + $0xf8] sm:$0xff]  ;;  %vm127_vm0 = vcmask 523264  }
  0x35   :  { %195 = vmatprep.mubr.f32.mxu0 %v705_v0  ;;  %266 = vmatprep.mubr.f32.mxu1 %v705_v0  ;;  %v101_v3 = vld [vmem:[#allocation5 + $0xe0] sm:$0xff]  ;;  %v103_v4 = vld [vmem:[#allocation5 + $0xf0] sm:$0xff]  ;;  %v98_v5 = vld [vmem:[#allocation5 + $0xc8] sm:$0xff]  ;;  %s706_s15 = smov [#allocation10]  }
  0x36   :  { %147 = vmatprep.subr.mxu0 %v102_v1  ;;  %218 = vmatprep.subr.mxu1 %v104_v2  ;;  %v100_v6 = vld [vmem:[#allocation5 + $0xd8] sm:$0xff]  ;;  %v97_v7 = vld [vmem:[#allocation5 + $0xc0] sm:$0xff]  ;;  %v99_v8 = vld [vmem:[#allocation5 + $0xd0] sm:$0xff]  ;;  %s495_s16 = sshll.u32 %s706_s15, 4  ;;  %s496_s16 = int_to_ptr.vmem [resolvable:$true] %s495_s16 }
  0x37   :  { %148 = vmatpush1.msra.mxu0 %v101_v3  ;;  %219 = vmatpush1.msra.mxu1 %v103_v4  ;;  %v94_v9 = vld [vmem:[#allocation5 + $0xa8] sm:$0xff]  ;;  %v96_v10 = vld [vmem:[#allocation5 + $0xb8] sm:$0xff]  ;;  %v93_v11 = vld [vmem:[#allocation5 + $0xa0] sm:$0xff]  ;;  %s669_s17 = scalar_lea.vmem %s496_s16, 128  ;;  %p674_p7 = scmp.lt.s32.totalorder %s496_s16, %s496_s16 }
  0x38   :  { %149 = vmatprep.subr.mxu0 %v98_v5  ;;  %220 = vmatprep.subr.mxu1 %v100_v6  ;;  %v95_v12 = vld [vmem:[#allocation5 + $0xb0] sm:$0xff]  ;;  %v90_v13 = vld [vmem:[#allocation5 + $0x88] sm:$0xff]  ;;  %v92_v14 = vld [vmem:[#allocation5 + $0x98] sm:$0xff]  ;;  %p670_p6 = scmp.ne.s32.totalorder %s496_s16, %s669_s17  ;;  %p675_p8 = scmp.lt.s32.totalorder %s669_s17, %s669_s17 }
  0x39   :  { %150 = vmatpush1.msra.mxu0 %v97_v7  ;;  %221 = vmatpush1.msra.mxu1 %v99_v8  ;;  %v89_v15 = vld [vmem:[#allocation5 + $0x80] sm:$0xff]  ;;  %v91_v16 = vld [vmem:[#allocation5 + $0x90] sm:$0xff]  ;;  %v86_v17 = vld [vmem:[#allocation5 + $0x68] sm:$0xff] }
  0x3a   :  { %151 = vmatprep.subr.mxu0 %v94_v9  ;;  %222 = vmatprep.subr.mxu1 %v96_v10  ;;  %v88_v18 = vld [vmem:[#allocation5 + $0x78] sm:$0xff]  ;;  %v85_v19 = vld [vmem:[#allocation5 + $0x60] sm:$0xff]  ;;  %v87_v20 = vld [vmem:[#allocation5 + $0x70] sm:$0xff]  ;;  %p676_p9 = por %p675_p8, %p674_p7 }
  0x3b   :  { %152 = vmatpush1.msra.mxu0 %v93_v11  ;;  %223 = vmatpush1.msra.mxu1 %v95_v12  ;;  %v82_v21 = vld [vmem:[#allocation5 + $0x48] sm:$0xff]  ;;  %v84_v22 = vld [vmem:[#allocation5 + $0x58] sm:$0xff]  ;;  %v81_v23 = vld [vmem:[#allocation5 + $0x40] sm:$0xff] }
  0x3c   :  { %153 = vmatprep.subr.mxu0 %v90_v13  ;;  %224 = vmatprep.subr.mxu1 %v92_v14  ;;  %v83_v24 = vld [vmem:[#allocation5 + $0x50] sm:$0xff]  ;;  %v78_v25 = vld [vmem:[#allocation5 + $0x28] sm:$0xff]  ;;  %v80_v26 = vld [vmem:[#allocation5 + $0x38] sm:$0xff]  ;;  %p677_p10 = pnand %p676_p9, %p670_p6 }
  0x3d   :  { %154 = vmatpush1.msra.mxu0 %v89_v15  ;;  %225 = vmatpush1.msra.mxu1 %v91_v16  ;;  %v77_v27 = vld [vmem:[#allocation5 + $0x20] sm:$0xff]  ;;  %v79_v28 = vld [vmem:[#allocation5 + $0x30] sm:$0xff]  ;;  %v74_v29 = vld [vmem:[#allocation5 + $0x8] sm:$0xff] }
  0x3e   :  { %155 = vmatprep.subr.mxu0 %v86_v17  ;;  %226 = vmatprep.subr.mxu1 %v88_v18  ;;  %v76_v30 = vld [vmem:[#allocation5 + $0x18] sm:$0xff]  ;;  %v73_v31 = vld [vmem:[#allocation5] sm:$0xff]  ;;  %v75_v32 = vld [vmem:[#allocation5 + $0x10] sm:$0xff] }
  0x3f   :  { %156 = vmatpush1.msra.mxu0 %v85_v19  ;;  %227 = vmatpush1.msra.mxu1 %v87_v20  ;;  %v72_v33 = vld [vmem:[#allocation2] sm:$0xff]  ;;  %v306_v42 = vld [vmem:[#allocation8 + $0xe8] sm:$0xff]  ;;  %v305_v46 = vld [vmem:[#allocation8 + $0xe0] sm:$0xff] }
  0x40   :  { %157 = vmatprep.subr.mxu0 %v82_v21  ;;  %228 = vmatprep.subr.mxu1 %v84_v22  ;;  %v308_v34 = vld [vmem:[#allocation8 + $0xf8] sm:$0xff]  ;;  %v307_v38 = vld [vmem:[#allocation8 + $0xf0] sm:$0xff]  ;;  %v338_v43 = vld [vmem:[#allocation8 + $0x1e8] sm:$0xff] }
  0x41   :  { %158 = vmatpush1.msra.mxu0 %v81_v23  ;;  %229 = vmatpush1.msra.mxu1 %v83_v24  ;;  %v340_v35 = vld [vmem:[#allocation8 + $0x1f8] sm:$0xff]  ;;  %v339_v39 = vld [vmem:[#allocation8 + $0x1f0] sm:$0xff]  ;;  %v290_v44 = vld [vmem:[#allocation8 + $0x68] sm:$0xff] }
  0x42   :  { %159 = vmatprep.subr.mxu0 %v78_v25  ;;  %230 = vmatprep.subr.mxu1 %v80_v26  ;;  %v292_v36 = vld [vmem:[#allocation8 + $0x78] sm:$0xff]  ;;  %v291_v40 = vld [vmem:[#allocation8 + $0x70] sm:$0xff]  ;;  %v322_v45 = vld [vmem:[#allocation8 + $0x168] sm:$0xff] }
  0x43   :  { %160 = vmatpush1.msra.mxu0 %v77_v27  ;;  %231 = vmatpush1.msra.mxu1 %v79_v28  ;;  %v324_v37 = vld [vmem:[#allocation8 + $0x178] sm:$0xff]  ;;  %v323_v41 = vld [vmem:[#allocation8 + $0x170] sm:$0xff]  ;;  %v337_v47 = vld [vmem:[#allocation8 + $0x1e0] sm:$0xff] }
  0x44   :  { %161 = vmatprep.subr.mxu0 %v74_v29  ;;  %232 = vmatprep.subr.mxu1 %v76_v30  ;;  %v289_v48 = vld [vmem:[#allocation8 + $0x60] sm:$0xff]  ;;  %v304_v50 = vld [vmem:[#allocation8 + $0xd8] sm:$0xff]  ;;  %v303_v54 = vld [vmem:[#allocation8 + $0xd0] sm:$0xff] }
  0x45   :  { %162 = vmatpush1.msra.mxu0 %v73_v31  ;;  %233 = vmatpush1.msra.mxu1 %v75_v32  ;;  %v321_v49 = vld [vmem:[#allocation8 + $0x160] sm:$0xff]  ;;  %v336_v51 = vld [vmem:[#allocation8 + $0x1d8] sm:$0xff]  ;;  %v335_v55 = vld [vmem:[#allocation8 + $0x1d0] sm:$0xff] }
  0x46   :  { %506 = vmatmul.mubr.msk.f32.vlgmr.msra.gmra.mxu0 %vm127_vm0, %v72_v33  ;;  %507 = vmatmul.mubr.msk.f32.vlgmr.msra.gmra.mxu1 %vm127_vm0, %v72_v33  ;;  %v288_v52 = vld [vmem:[#allocation8 + $0x58] sm:$0xff]  ;;  %v287_v56 = vld [vmem:[#allocation8 + $0x50] sm:$0xff]  ;;  %v302_v58 = vld [vmem:[#allocation8 + $0xc8] sm:$0xff] }
  0x47   :  { %509 = vmatprep.subr.mxu0 %v308_v34  ;;  %544 = vmatprep.subr.mxu1 %v340_v35  ;;  %v320_v53 = vld [vmem:[#allocation8 + $0x158] sm:$0xff]  ;;  %v319_v57 = vld [vmem:[#allocation8 + $0x150] sm:$0xff]  ;;  %v334_v59 = vld [vmem:[#allocation8 + $0x1c8] sm:$0xff]  ;;  %v107_v34 = vlaneseq }
  0x48   :  { %510 = vmatpush3.msra.mxu0 %v292_v36  ;;  %545 = vmatpush3.msra.mxu1 %v324_v37  ;;  %v286_v60 = vld [vmem:[#allocation8 + $0x48] sm:$0xff]  ;;  %v301_v62 = vld [vmem:[#allocation8 + $0xc0] sm:$0xff]  ;;  %v300_v2 = vld [vmem:[#allocation8 + $0xb8] sm:$0xff] }
  0x49   :  { %511 = vmatprep.subr.mxu0 %v307_v38  ;;  %546 = vmatprep.subr.mxu1 %v339_v39  ;;  %v318_v61 = vld [vmem:[#allocation8 + $0x148] sm:$0xff]  ;;  %v333_v63 = vld [vmem:[#allocation8 + $0x1c0] sm:$0xff]  ;;  %v332_v3 = vld [vmem:[#allocation8 + $0x1b8] sm:$0xff]  ;;  %v108_v35 = vshrl.u32 %v107_v34, 7 }
  0x4a   :  { %512 = vmatpush3.msra.mxu0 %v291_v40  ;;  %547 = vmatpush3.msra.mxu1 %v323_v41  ;;  %v285_v0 = vld [vmem:[#allocation8 + $0x40] sm:$0xff]  ;;  %v284_v4 = vld [vmem:[#allocation8 + $0x38] sm:$0xff]  ;;  %v299_v6 = vld [vmem:[#allocation8 + $0xb0] sm:$0xff] }
  0x4b   :  { %513 = vmatprep.subr.mxu0 %v306_v42  ;;  %548 = vmatprep.subr.mxu1 %v338_v43  ;;  %v317_v1 = vld [vmem:[#allocation8 + $0x140] sm:$0xff]  ;;  %v316_v5 = vld [vmem:[#allocation8 + $0x138] sm:$0xff]  ;;  %v331_v7 = vld [vmem:[#allocation8 + $0x1b0] sm:$0xff]  ;;  %v117_v36 = vsub.s32 2, %v108_v35  ;;  %v109_v37 = vsub.s32 0, %v108_v35  ;;  %v113_v39 = vsub.s32 1, %v108_v35 }
  0x4c   :  { %514 = vmatpush3.msra.mxu0 %v290_v44  ;;  %549 = vmatpush3.msra.mxu1 %v322_v45  ;;  %v283_v8 = vld [vmem:[#allocation8 + $0x30] sm:$0xff]  ;;  %v298_v10 = vld [vmem:[#allocation8 + $0xa8] sm:$0xff]  ;;  %v297_v14 = vld [vmem:[#allocation8 + $0xa0] sm:$0xff]  ;;  %v121_v40 = vsub.s32 3, %v108_v35 }
  0x4d   :  { %515 = vmatprep.subr.mxu0 %v305_v46  ;;  %550 = vmatprep.subr.mxu1 %v337_v47  ;;  %v315_v9 = vld [vmem:[#allocation8 + $0x130] sm:$0xff]  ;;  %v330_v11 = vld [vmem:[#allocation8 + $0x1a8] sm:$0xff]  ;;  %v329_v15 = vld [vmem:[#allocation8 + $0x1a0] sm:$0xff] }
  0x4e   :  { %516 = vmatpush3.msra.mxu0 %v289_v48  ;;  %551 = vmatpush3.msra.mxu1 %v321_v49  ;;  %v282_v12 = vld [vmem:[#allocation8 + $0x28] sm:$0xff]  ;;  %v281_v16 = vld [vmem:[#allocation8 + $0x20] sm:$0xff]  ;;  %v296_v18 = vld [vmem:[#allocation8 + $0x98] sm:$0xff] }
  0x4f   :  { %517 = vmatprep.subr.mxu0 %v304_v50  ;;  %552 = vmatprep.subr.mxu1 %v336_v51  ;;  %v314_v13 = vld [vmem:[#allocation8 + $0x128] sm:$0xff]  ;;  %v313_v17 = vld [vmem:[#allocation8 + $0x120] sm:$0xff]  ;;  %v328_v19 = vld [vmem:[#allocation8 + $0x198] sm:$0xff] }
  0x50   :  { %518 = vmatpush3.msra.mxu0 %v288_v52  ;;  %553 = vmatpush3.msra.mxu1 %v320_v53  ;;  %v280_v20 = vld [vmem:[#allocation8 + $0x18] sm:$0xff]  ;;  %v295_v22 = vld [vmem:[#allocation8 + $0x90] sm:$0xff]  ;;  %v294_v26 = vld [vmem:[#allocation8 + $0x88] sm:$0xff] }
  0x51   :  { %519 = vmatprep.subr.mxu0 %v303_v54  ;;  %554 = vmatprep.subr.mxu1 %v335_v55  ;;  %v312_v21 = vld [vmem:[#allocation8 + $0x118] sm:$0xff]  ;;  %v327_v23 = vld [vmem:[#allocation8 + $0x190] sm:$0xff]  ;;  %v326_v27 = vld [vmem:[#allocation8 + $0x188] sm:$0xff] }
  0x52   :  { %520 = vmatpush3.msra.mxu0 %v287_v56  ;;  %555 = vmatpush3.msra.mxu1 %v319_v57  ;;  %v279_v24 = vld [vmem:[#allocation8 + $0x10] sm:$0xff]  ;;  %v278_v28 = vld [vmem:[#allocation8 + $0x8] sm:$0xff]  ;;  %v293_v30 = vld [vmem:[#allocation8 + $0x80] sm:$0xff] }
  0x53   :  { %521 = vmatprep.subr.mxu0 %v302_v58  ;;  %556 = vmatprep.subr.mxu1 %v334_v59  ;;  %v311_v25 = vld [vmem:[#allocation8 + $0x110] sm:$0xff]  ;;  %v310_v29 = vld [vmem:[#allocation8 + $0x108] sm:$0xff]  ;;  %v325_v31 = vld [vmem:[#allocation8 + $0x180] sm:$0xff] }
  0x54   :  { %522 = vmatpush3.msra.mxu0 %v286_v60  ;;  %557 = vmatpush3.msra.mxu1 %v318_v61  ;;  %v277_v32 = vld [vmem:[#allocation8] sm:$0xff]  ;;  %v105_v38 = vld [vmem:[#allocation7] sm:$0xf]  ;;  %v508_v59 = vld [vmem:[%s759_s4] ss:$0 sm:$0xff] }
  0x55   :  { %523 = vmatprep.subr.mxu0 %v301_v62  ;;  %558 = vmatprep.subr.mxu1 %v333_v63  ;;  %v309_v33 = vld [vmem:[#allocation8 + $0x100] sm:$0xff]  ;;  %v118_v41 = vrot.slane %v105_v38, %v117_v36  ;;  %v110_v42 = vrot.slane %v105_v38, %v109_v37  ;;  %v114_v43 = vrot.slane %v105_v38, %v113_v39 }
  0x56   :  { %524 = vmatpush3.msra.mxu0 %v285_v0  ;;  %559 = vmatpush3.msra.mxu1 %v317_v1  ;;  %v122_v44 = vrot.slane %v105_v38, %v121_v40 }
  0x57   :  { %525 = vmatprep.subr.mxu0 %v300_v2  ;;  %560 = vmatprep.subr.mxu1 %v332_v3 }
  0x58   :  { %526 = vmatpush3.msra.mxu0 %v284_v4  ;;  %561 = vmatpush3.msra.mxu1 %v316_v5 }
  0x59   :  { %527 = vmatprep.subr.mxu0 %v299_v6  ;;  %562 = vmatprep.subr.mxu1 %v331_v7 }
  0x5a   :  { %528 = vmatpush3.msra.mxu0 %v283_v8  ;;  %563 = vmatpush3.msra.mxu1 %v315_v9 }
  0x5b   :  { %529 = vmatprep.subr.mxu0 %v298_v10  ;;  %564 = vmatprep.subr.mxu1 %v330_v11 }
  0x5c   :  { %530 = vmatpush3.msra.mxu0 %v282_v12  ;;  %565 = vmatpush3.msra.mxu1 %v314_v13 }
  0x5d   :  { %531 = vmatprep.subr.mxu0 %v297_v14  ;;  %566 = vmatprep.subr.mxu1 %v329_v15 }
  0x5e   :  { %532 = vmatpush3.msra.mxu0 %v281_v16  ;;  %567 = vmatpush3.msra.mxu1 %v313_v17 }
  0x5f   :  { %533 = vmatprep.subr.mxu0 %v296_v18  ;;  %568 = vmatprep.subr.mxu1 %v328_v19 }
  0x60   :  { %534 = vmatpush3.msra.mxu0 %v280_v20  ;;  %569 = vmatpush3.msra.mxu1 %v312_v21 }
  0x61   :  { %535 = vmatprep.subr.mxu0 %v295_v22  ;;  %570 = vmatprep.subr.mxu1 %v327_v23 }
  0x62   :  { %536 = vmatpush3.msra.mxu0 %v279_v24  ;;  %571 = vmatpush3.msra.mxu1 %v311_v25 }
  0x63   :  { %537 = vmatprep.subr.mxu0 %v294_v26  ;;  %572 = vmatprep.subr.mxu1 %v326_v27 }
  0x64   :  { %538 = vmatpush3.msra.mxu0 %v278_v28  ;;  %573 = vmatpush3.msra.mxu1 %v310_v29 }
  0x65   :  { %539 = vmatprep.subr.mxu0 %v293_v30  ;;  %574 = vmatprep.subr.mxu1 %v325_v31 }
  0x66   :  { %540 = vmatpush3.msra.mxu0 %v277_v32  ;;  %575 = vmatpush3.msra.mxu1 %v309_v33 }
 0x106   :  { %v197_v45 = vpop.f32.mrf.mxu0  ;;  %v268_v46 = vpop.f32.mrf.mxu1 }
 0x107   :  { %v269_v47 = vadd.f32 %v268_v46, %v118_v41  ;;  %v198_v48 = vadd.f32 %v197_v45, %v110_v42 }
 0x108   :  { %v199_v49 = vpop.f32.mrf.mxu0  ;;  %v270_v50 = vpop.f32.mrf.mxu1 }
 0x109   :  { %v200_v51 = vadd.f32 %v199_v49, %v114_v43  ;;  %v271_v52 = vadd.f32 %v270_v50, %v122_v44  ;;  %v275_v53 = vmax.f32 %v269_v47, 0.0  ;;  %v273_v56 = vmax.f32 %v198_v48, 0.0 }
 0x10b   :  { %v274_v54 = vmax.f32 %v200_v51, 0.0  ;;  %v276_v55 = vmax.f32 %v271_v52, 0.0 }
 0x10d   :  { %412 = vmatprep.mubr.f32.mxu0 %v274_v54  ;;  %482 = vmatprep.mubr.f32.mxu1 %v276_v55 }
 0x10e   :  { %413 = vmatmul.mubr.f32.vlgmr.msra.gmra.mxu0 %v273_v56  ;;  %483 = vmatmul.mubr.f32.vlgmr.msra.gmra.mxu1 %v275_v53 }
 0x1ce   :  { %v541_v57 = vpop.f32.mrf.mxu0  ;;  %v576_v58 = vpop.f32.mrf.mxu1 }
 0x1d0   :  { %v542_v60 = vpop.f32.mrf.mxu0  ;;  %v577_v61 = vpop.f32.mrf.mxu1 }
 0x1d1   :  { %v543_v62 = vadd.f32 %v542_v60, %v541_v57  ;;  %v578_v0 = vadd.f32 %v577_v61, %v576_v58 }
 0x1d3   :  { %v415_v63 = vadd.f32 %v543_v62, %v508_v59 }
 0x1d5   :  { %v485_v1 = vadd.f32 %v578_v0, %v415_v63 }
 0x1d7   :  { %488 = vst [vmem:[#allocation10] sm:$0xff] %v485_v1 }
 0x1d8   :  { %680 = shalt.err (!%p677_p10)
}
 0x1d9   :  { %498 = dma.vmem_to_hbm [thread:$0]  %s496_s16, 128, %s760_s5, [#allocation4]  }
 0x1da   :  { %695 = dma.done.wait [#allocation4], 128  }
 0x1db   :  { %696 = vsyncadd [#allocation4], 4294967168 }
 0x1dc   :  { %502 = vsyncpa [#allocation3], 1 }
 0x1dd   :  { %503 = vsyncpa [#allocation6], 1 }
 0x1de   :  { %504 = vsyncpa [#allocation9], 1 }
 0x1df   :  { %505 = vsyncpa [#allocation4], 1 }

</bundles_post_ra>
